<compile_context>
chip_gen: v6e
topology: v6e:2x2x1
jax: 0.10.0
libtpu: 0.0.40
codegen_flags: <defaults>
</compile_context>

<pallas_src>
import functools

import jax
import jax.numpy as jnp
from jax import lax
from jax.experimental import pallas as pl
from jax.experimental.pallas import tpu as pltpu


def _round_up(x, m):
    return ((x + m - 1) // m) * m


def gcn_influence_kernel(a_ref, xw_ref, b_ref, o_ref, *, f_valid):
    # A_hat row-tile @ (X @ W): MXU, bf16 (or f32) inputs, f32 accumulation.
    h = jnp.dot(a_ref[...], xw_ref[...], preferred_element_type=jnp.float32)
    h = h + b_ref[...]
    h = jnp.maximum(h, 0.0)  # relu

    # Row softmax over the *valid* feature columns only (lanes padded to 128).
    col = lax.broadcasted_iota(jnp.int32, h.shape, 1)
    valid = col < f_valid
    hm = jnp.where(valid, h, -jnp.inf)
    m = jnp.max(hm, axis=1, keepdims=True)
    e = jnp.exp(hm - m)  # exp(-inf) == 0 zeroes padded lanes
    s = jnp.sum(e, axis=1, keepdims=True)
    o_ref[...] = e * pl.reciprocal(s, approx=True)


def gcn_influence(a_norm, onehot, weight, bias, gcn_layers=4,
                  compute_dtype=jnp.bfloat16, block_m=None):
    """Fused GCN layer + row softmax.

    gcn_layers is accepted for API parity: the reference loop re-applies the
    same conv to `onehot`, so one pass is semantically identical.
    """
    del gcn_layers  # see note above
    n, f = onehot.shape
    assert a_norm.shape == (n, n)

    # Hoisted feature transform X @ W (tiny; plain XLA, f32). X is one-hot, so
    # this is just a row-gather of W — never recomputed inside the grid.
    xw = jnp.dot(onehot.astype(jnp.float32), weight.astype(jnp.float32))

    # Pad: features -> multiple of 128 (lane-dense), rows -> multiple of TM.
    f_pad = _round_up(max(f, 128), 128)
    n8 = _round_up(n, 8)
    if block_m is None:
        # Sized so 2 double-buffered bf16 A tiles fit comfortably in 64 MiB VMEM
        # (v7x) for large N; tiny problems collapse to a single tile.
        block_m = min(n8, 512)
    block_m = _round_up(min(block_m, n8), 8)
    n_pad = _round_up(n8, block_m)

    a_p = jnp.zeros((n_pad, n_pad), compute_dtype).at[:n, :n].set(
        a_norm.astype(compute_dtype))
    xw_p = jnp.zeros((n_pad, f_pad), compute_dtype).at[:n, :f].set(
        xw.astype(compute_dtype))
    b_p = jnp.zeros((1, f_pad), jnp.float32).at[0, :f].set(
        bias.astype(jnp.float32))

    grid = (n_pad // block_m,)

    # Rough VMEM budget: A tile (x2 buffers) + XW + bias + out tile (x2).
    itemsize = jnp.dtype(compute_dtype).itemsize
    vmem_bytes = (2 * block_m * n_pad * itemsize
                  + n_pad * f_pad * itemsize
                  + f_pad * 4
                  + 2 * block_m * f_pad * 4)
    vmem_limit = int(min(48 * 1024 * 1024, max(16 * 1024 * 1024, 2 * vmem_bytes)))

    call = pl.pallas_call(
        functools.partial(gcn_influence_kernel, f_valid=f),
        out_shape=jax.ShapeDtypeStruct((n_pad, f_pad), jnp.float32),
        grid_spec=pltpu.PrefetchScalarGridSpec(
            num_scalar_prefetch=0,
            grid=grid,
            in_specs=[
                pl.BlockSpec((block_m, n_pad), lambda i: (i, 0)),  # A_hat row tile
                pl.BlockSpec((n_pad, f_pad), lambda i: (0, 0)),    # XW (grid-invariant)
                pl.BlockSpec((1, f_pad), lambda i: (0, 0)),        # bias
            ],
            out_specs=pl.BlockSpec((block_m, f_pad), lambda i: (i, 0)),
        ),
        compiler_params=pltpu.CompilerParams(
            dimension_semantics=("parallel",),
            vmem_limit_bytes=vmem_limit,
        ),
    )
    out = call(a_p, xw_p, b_p)
    return out[:n, :f]


def build_norm_adj(edge_index, num_nodes):
    """Dense D^{-1/2}(A+I)D^{-1/2}, matching PyG gcn_norm with self-loops (f32)."""
    src, dst = edge_index[0], edge_index[1]
    loop = jnp.arange(num_nodes, dtype=src.dtype)
    src = jnp.concatenate([src, loop])
    dst = jnp.concatenate([dst, loop])
    ew = jnp.ones(src.shape[0], dtype=jnp.float32)
    deg = jnp.zeros((num_nodes,), jnp.float32).at[dst].add(ew)
    dis = jnp.where(deg > 0, 1.0 / jnp.sqrt(deg), 0.0)
    norm = dis[src] * dis[dst]
    # out[i] = sum_{edges j->i} norm_ij * x[j]  =>  A[dst, src] = norm
    a = jnp.zeros((num_nodes, num_nodes), jnp.float32).at[dst, src].add(norm)
    return a


def reference_jax(a_norm, onehot, weight, bias):
    h = a_norm @ (onehot @ weight) + bias[None, :]
    h = jnp.maximum(h, 0.0)
    return jax.nn.softmax(h, axis=1)


if __name__ == "__main__":
    # ---------------- test 1: small ring graph, one-hot features ------------
    num_nodes = 16
    num_features = 16

    key = jax.random.PRNGKey(0)
    kw, ke = jax.random.split(key)

    limit = jnp.sqrt(6.0 / (num_features + num_features))
    weight = jax.random.uniform(
        kw, (num_features, num_features), jnp.float32, -limit, limit)
    bias = jnp.zeros((num_features,), jnp.float32)

    idx = jnp.arange(num_nodes, dtype=jnp.int32)
    nxt = (idx + 1) % num_nodes
    edge_index = jnp.stack(
        [jnp.concatenate([idx, nxt]), jnp.concatenate([nxt, idx])], axis=0)

    onehot = jnp.eye(num_nodes, num_features, dtype=jnp.float32)
    a_norm = build_norm_adj(edge_index, num_nodes)
    ref = reference_jax(a_norm, onehot, weight, bias)

    # f32 kernel path (only approx reciprocal differs from the reference).
    out_f32 = gcn_influence(a_norm, onehot, weight, bias,
                            compute_dtype=jnp.float32)
    out_f32 = jax.block_until_ready(out_f32)
    assert out_f32.shape == (num_nodes, num_features)
    assert jnp.allclose(out_f32, ref, atol=1e-4, rtol=1e-3), "f32 kernel mismatch"

    # default bf16-input path (MXU bf16 with f32 accumulation).
    out_bf16 = gcn_influence(a_norm, onehot, weight, bias)
    out_bf16 = jax.block_until_ready(out_bf16)
    assert jnp.allclose(out_bf16, ref, atol=2e-2, rtol=2e-2), "bf16 kernel mismatch"

    # ---------------- test 2: multi-tile grid + padded rows/features --------
    n2, f2 = 200, 48
    k1, k2, k3 = jax.random.split(ke, 3)
    src2 = jax.random.randint(k1, (400,), 0, n2, dtype=jnp.int32)
    dst2 = jax.random.randint(k2, (400,), 0, n2, dtype=jnp.int32)
    edge_index2 = jnp.stack([jnp.concatenate([src2, dst2]),
                             jnp.concatenate([dst2, src2])], axis=0)
    limit2 = jnp.sqrt(6.0 / (f2 + f2))
    weight2 = jax.random.uniform(k3, (f2, f2), jnp.float32, -limit2, limit2)
    bias2 = jnp.zeros((f2,), jnp.float32)
    onehot2 = jnp.eye(n2, f2, dtype=jnp.float32)
    a_norm2 = build_norm_adj(edge_index2, n2)

    out2 = gcn_influence(a_norm2, onehot2, weight2, bias2, block_m=64)
    out2 = jax.block_until_ready(out2)
    ref2 = reference_jax(a_norm2, onehot2, weight2, bias2)
    assert out2.shape == (n2, f2)
    assert jnp.allclose(out2, ref2, atol=2e-2, rtol=2e-2), "tiled kernel mismatch"

    print("KERNEL_OK")
</pallas_src>

<mosaic_0001>
module attributes {stable_mosaic.version = 11 : i64} {
  func.func @gcn_influence_kernel(%arg0: i32, %arg1: memref<16x16xf32, #tpu.memory_space<vmem>>, %arg2: memref<16x128xf32, #tpu.memory_space<vmem>>, %arg3: memref<1x128xf32, #tpu.memory_space<vmem>>, %arg4: memref<16x128xf32, #tpu.memory_space<vmem>>) attributes {dimension_semantics = [#tpu.dimension_semantics<parallel>], iteration_bounds = array<i64: 1>, scalar_prefetch = 0 : i64, scratch_operands = 0 : i64, tpu.core_type = #tpu.core_type<tc>, window_params = [{transform_indices = @transform_0, window_bounds = array<i64: 16, 16>}, {pipeline_mode = #tpu.pipeline_mode<synchronous>, transform_indices = @transform_1, window_bounds = array<i64: 16, 128>}, {pipeline_mode = #tpu.pipeline_mode<synchronous>, transform_indices = @transform_2, window_bounds = array<i64: 1, 128>}, {transform_indices = @transform_3, window_bounds = array<i64: 16, 128>}]} {
    %c0 = arith.constant 0 : index
    %c0_0 = arith.constant 0 : index
    %0 = vector.load %arg1[%c0, %c0_0] : memref<16x16xf32, #tpu.memory_space<vmem>>, vector<16x16xf32>
    %c0_1 = arith.constant 0 : index
    %c0_2 = arith.constant 0 : index
    %1 = vector.load %arg2[%c0_1, %c0_2] : memref<16x128xf32, #tpu.memory_space<vmem>>, vector<16x128xf32>
    %cst = arith.constant dense<0.000000e+00> : vector<16x128xf32>
    %2 = tpu.matmul %0, %1, %cst {dimension_numbers = #tpu.dot_dimension_numbers<[1], [0], [0], [1], [0, 0, 1, 1], [], []>} : vector<16x16xf32>, vector<16x128xf32>, vector<16x128xf32> -> vector<16x128xf32>
    %c0_3 = arith.constant 0 : index
    %c0_4 = arith.constant 0 : index
    %3 = vector.load %arg3[%c0_3, %c0_4] : memref<1x128xf32, #tpu.memory_space<vmem>>, vector<1x128xf32>
    %4 = vector.broadcast %3 : vector<1x128xf32> to vector<16x128xf32>
    %5 = arith.addf %2, %4 : vector<16x128xf32>
    %cst_5 = arith.constant 0.000000e+00 : f32
    %6 = vector.broadcast %cst_5 : f32 to vector<16x128xf32>
    %7 = arith.maximumf %5, %6 : vector<16x128xf32>
    %8 = tpu.iota {dimensions = array<i32: 1>} : vector<16x128xi32>
    %c16_i32 = arith.constant 16 : i32
    %9 = vector.broadcast %c16_i32 : i32 to vector<16x128xi32>
    %10 = arith.cmpi slt, %8, %9 : vector<16x128xi32>
    %cst_6 = arith.constant 0xFF800000 : f32
    %11 = vector.broadcast %cst_6 : f32 to vector<16x128xf32>
    %12 = arith.select %10, %7, %11 : vector<16x128xi1>, vector<16x128xf32>
    %cst_7 = arith.constant dense<0xFF800000> : vector<16xf32>
    %13 = vector.multi_reduction <maximumf>, %12, %cst_7 [1] : vector<16x128xf32> to vector<16xf32>
    %14 = vector.shape_cast %13 : vector<16xf32> to vector<16x1xf32>
    %15 = vector.broadcast %14 : vector<16x1xf32> to vector<16x128xf32>
    %16 = arith.subf %12, %15 : vector<16x128xf32>
    %17 = math.exp %16 : vector<16x128xf32>
    %cst_8 = arith.constant dense<0.000000e+00> : vector<16xf32>
    %18 = vector.multi_reduction <add>, %17, %cst_8 [1] : vector<16x128xf32> to vector<16xf32>
    %19 = vector.shape_cast %18 : vector<16xf32> to vector<16x1xf32>
    %20 = tpu.reciprocal %19 {approx = true} : vector<16x1xf32> -> vector<16x1xf32>
    %21 = vector.broadcast %20 : vector<16x1xf32> to vector<16x128xf32>
    %22 = arith.mulf %17, %21 : vector<16x128xf32>
    %c0_9 = arith.constant 0 : index
    %c0_10 = arith.constant 0 : index
    %23 = vector.load %arg4[%c0_9, %c0_10] : memref<16x128xf32, #tpu.memory_space<vmem>>, vector<16x128xf32>
    tpu.vector_store %arg4[%c0_9, %c0_10], %22 {strides = array<i32>} : memref<16x128xf32, #tpu.memory_space<vmem>>, vector<16x128xf32>,
    return
  }
  func.func @transform_0(%arg0: i32) -> (i32, i32) {
    %c0_i32 = arith.constant 0 : i32
    %c0_i32_0 = arith.constant 0 : i32
    return %arg0, %c0_i32 : i32, i32
  }
  func.func @transform_1(%arg0: i32) -> (i32, i32) {
    %c0_i32 = arith.constant 0 : i32
    %c0_i32_0 = arith.constant 0 : i32
    %c0_i32_1 = arith.constant 0 : i32
    return %c0_i32, %c0_i32_0 : i32, i32
  }
  func.func @transform_2(%arg0: i32) -> (i32, i32) {
    %c0_i32 = arith.constant 0 : i32
    %c0_i32_0 = arith.constant 0 : i32
    %c0_i32_1 = arith.constant 0 : i32
    return %c0_i32, %c0_i32_0 : i32, i32
  }
  func.func @transform_3(%arg0: i32) -> (i32, i32) {
    %c0_i32 = arith.constant 0 : i32
    %c0_i32_0 = arith.constant 0 : i32
    return %arg0, %c0_i32 : i32, i32
  }
}

</mosaic_0001>

<bundles_post_ra>
// kernel: tpu_custom_call.1
= control target key start
LH: loop header
LB: loop body
LE: loop exit
PB: predicated region body
PF: predicated region fallthrough
CT: control target
= control target key end

     0   :  { %8 = vsyncpa [#allocation3], 0  ;;  %s320_s0 = inlined_call_operand.hbm [shape: f32[16,16], index: 0, kind: input, shape index: {}]   ;;  %s321_s1 = inlined_call_operand.hbm [shape: f32[16,128], index: 1, kind: input, shape index: {}]   ;;  %s322_s2 = inlined_call_operand.vmem [shape: f32[1,128], index: 2, kind: input, shape index: {}]   ;;  %s323_s3 = inlined_call_operand.hbm [shape: f32[16,128], index: 3, kind: output, shape index: {}]  }
   0x1   :  { %9 = vsyncpa [#allocation6], 0 }
   0x2   :  { %10 = vsyncpa [#allocation4], 0  ;;  %s274_s12 = smov [#allocation2]  }
   0x3   :  { %s16_s13 = sshll.u32 %s274_s12, 4  ;;  %s17_s13 = int_to_ptr.vmem [resolvable:$true] %s16_s13 }
   0x4   :  { %s216_s14 = scalar_lea.vmem %s17_s13, 256  ;;  %p221_p1 = scmp.lt.s32.totalorder %s17_s13, %s17_s13 }
   0x5   :  { %p217_p0 = scmp.ne.s32.totalorder %s17_s13, %s216_s14  ;;  %p222_p2 = scmp.lt.s32.totalorder %s216_s14, %s216_s14 }
   0x7   :  { %p223_p3 = por %p222_p2, %p221_p1 }
   0x9   :  { %p224_p4 = pnand %p223_p3, %p217_p0 }
   0xb   :  { %227 = shalt.err (!%p224_p4)
}
   0xc   :  { %s275_s15 = smov 128   ;;  %s276_s16 = smov 8  }
   0xd   :  { %22 = dma.hbm_to_vmem [thread:$0]  %s320_s0, 256, %s17_s13, [#allocation3], %s275_s15, %s275_s15, %s276_s16  }
   0xe   :  { %s277_s19 = smov [#allocation5]  }
   0xf   :  { %s28_s20 = sshll.u32 %s277_s19, 4  ;;  %s29_s20 = int_to_ptr.vmem [resolvable:$true] %s28_s20 }
  0x10   :  { %s236_s21 = scalar_lea.vmem %s29_s20, 256  ;;  %p241_p6 = scmp.lt.s32.totalorder %s29_s20, %s29_s20 }
  0x11   :  { %p237_p5 = scmp.ne.s32.totalorder %s29_s20, %s236_s21  ;;  %p242_p7 = scmp.lt.s32.totalorder %s236_s21, %s236_s21 }
  0x13   :  { %p243_p8 = por %p242_p7, %p241_p6 }
  0x15   :  { %p244_p9 = pnand %p243_p8, %p237_p5 }
  0x17   :  { %247 = shalt.err (!%p244_p9)
}
  0x18   :  { %34 = dma.hbm_to_vmem [thread:$0]  %s321_s1, 256, %s29_s20, [#allocation6], %s275_s15, %s275_s15, %s276_s16  }
  0x19   :  { %268 = dma.done.wait [#allocation3], 256  }
  0x1a   :  { %269 = vsyncadd [#allocation3], 4294967040 }
  0x1b   :  { %270 = dma.done.wait [#allocation6], 256  }
  0x1c   :  { %271 = vsyncadd [#allocation6], 4294967040  ;;  %vm54_vm0 = vcmask 130048   ;;  %v46_v0 = vld [vmem:[#allocation5 + $0x8] sm:$0xff]  ;;  %v45_v1 = vld [vmem:[#allocation5] sm:$0xff]  ;;  %v138_v4 = vlaneseq  ;;  %s278_s1 = smov [#allocation7]  }
  0x1d   :  { %v43_v2 = vld [vmem:[#allocation2] sm:$0xff]  ;;  %188 = vmatprep.subr.mxu0 %v46_v0  ;;  %v44_v3 = vld [vmem:[#allocation2 + $0x8] sm:$0xff] }
  0x1e   :  { %192 = vmatprep.mubr.msk.f32.mxu0 %vm54_vm0, %v43_v2  ;;  %189 = vmatpush3.msra.mxu0 %v46_v0  ;;  %v181_v6 = vld [vmem:[%s322_s2] ss:$0 sm:$0xff]  ;;  %v139_v8 = vand.u32 127, %v138_v4  ;;  %s168_s2 = sshll.u32 %s278_s1, 4  ;;  %s169_s2 = int_to_ptr.vmem [resolvable:$true] %s168_s2 }
  0x1f   :  { %190 = vmatprep.subr.mxu0 %v45_v1  ;;  %s248_s25 = scalar_lea.vmem %s169_s2, 256  ;;  %p253_p11 = scmp.lt.s32.totalorder %s169_s2, %s169_s2 }
  0x20   :  { %191 = vmatpush3.msra.mxu0 %v45_v1  ;;  %vm140_vm1 = vcmp.lt.s32.totalorder %v139_v8, 16  ;;  %p249_p10 = scmp.ne.s32.totalorder %s169_s2, %s248_s25  ;;  %p254_p12 = scmp.lt.s32.totalorder %s248_s25, %s248_s25 }
  0x21   :  { %193 = vmatmul.mubr.msk.f32.vlgmr.msra.gmra.mxu0 %vm54_vm0, %v44_v3 }
  0x22   :  { %p255_p13 = por %p254_p12, %p253_p11 }
  0x24   :  { %p256_p0 = pnand %p255_p13, %p249_p10 }
  0xe1   :  { %v194_v5 = vpop.f32.mrf.mxu0 }
  0xe2   :  { %v133_v9 = vadd.f32 %v194_v5, %v181_v6 }
  0xe3   :  { %v127_v7 = vpop.f32.mrf.mxu0 }
  0xe4   :  { %v128_v10 = vadd.f32 %v181_v6, %v127_v7  ;;  %v137_v12 = vmax.f32 %v133_v9, 0.0 }
  0xe6   :  { %v136_v11 = vmax.f32 %v128_v10, 0.0  ;;  %v142_v14 = vsel %vm140_vm1, %v137_v12, -inf }
  0xe8   :  { %v141_v13 = vsel %vm140_vm1, %v136_v11, -inf }
  0xe9   :  { %143 = vmax.xlane.f32.xlu0 %v141_v13 }
  0xed   :  { %145 = vmax.xlane.f32.xlu0 %v142_v14 }
 0x172   :  { %v144_v15 = vpop.xlane.xlu0 %143 }
 0x173   :  { %v147_v16 = vsub.f32 %v141_v13, %v144_v15 }
 0x175   :  { %v149_v17 = vmul.f32 1.442695, %v147_v16 }
 0x176   :  { %v146_v18 = vpop.xlane.xlu0 %145 }
 0x177   :  { %200 = vpow2.f32 %v149_v17  ;;  %v148_v19 = vsub.f32 %v142_v14, %v146_v18 }
 0x179   :  { %v151_v20 = vmul.f32 1.442695, %v148_v19 }
 0x17b   :  { %202 = vpow2.f32 %v151_v20 }
 0x184   :  { %v201_v21 = vpop.eup %200 }
 0x185   :  { %153 = vadd.xlane.f32.xlu1 %v201_v21 }
 0x188   :  { %v203_v22 = vpop.eup %202 }
 0x189   :  { %155 = vadd.xlane.f32.xlu1 %v203_v22 }
 0x20e   :  { %v154_v23 = vpop.xlane.xlu1 %153 }
 0x20f   :  { %204 = vrcp.f32 %v154_v23 }
 0x212   :  { %v156_v24 = vpop.xlane.xlu1 %155 }
 0x213   :  { %206 = vrcp.f32 %v156_v24 }
 0x21c   :  { %v205_v25 = vpop.eup %204 }
 0x21d   :  { %v159_v26 = vmul.f32 %v205_v25, %v201_v21 }
 0x21f   :  { %161 = vst [vmem:[#allocation7] sm:$0xff] %v159_v26 }
 0x220   :  { %v207_v27 = vpop.eup %206 }
 0x221   :  { %v160_v28 = vmul.f32 %v207_v27, %v203_v22 }
 0x223   :  { %162 = vst [vmem:[#allocation7 + $0x8] sm:$0xff] %v160_v28 }
 0x224   :  { %259 = shalt.err (!%p256_p0)
}
 0x225   :  { %174 = dma.vmem_to_hbm [thread:$0]  %s169_s2, 256, %s323_s3, [#allocation4], %s275_s15, %s275_s15, %s276_s16  }
 0x226   :  { %272 = dma.done.wait [#allocation4], 256  }
 0x227   :  { %273 = vsyncadd [#allocation4], 4294967040 }
 0x228   :  { %178 = vsyncpa [#allocation3], 1 }
 0x229   :  { %179 = vsyncpa [#allocation6], 1 }
 0x22a   :  { %180 = vsyncpa [#allocation4], 1 }

</bundles_post_ra>
